<compile_context>
chip_gen: v5e
topology: v5e:2x2
jax: 0.10.0
libtpu: 0.0.40
codegen_flags: <defaults>
</compile_context>

<pallas_src>
import math
from functools import partial

import jax
import jax.numpy as jnp
from jax.experimental import pallas as pl
from jax.experimental.pallas import tpu as pltpu

_SUBLANE = 8


def _round_up(v, m):
    return ((v + m - 1) // m) * m


def extra_feature_kernel(x_ref, wgb_ref, o_ref, *, k, gamma_row):
    # ---- Linear (bias omitted: cancelled by the BN batch-mean subtraction) ----
    w = wgb_ref[0:k, :]                                   # (K, N) sublane-aligned view
    y = jnp.dot(x_ref[...], w, preferred_element_type=jnp.float32)

    # ---- BatchNorm1d, training mode: biased batch statistics over axis 0 ----
    mean = jnp.mean(y, axis=0, keepdims=True)
    diff = y - mean
    var = jnp.mean(diff * diff, axis=0, keepdims=True)

    # gamma fused into the rsqrt scale: (1, N) mul instead of an extra (B, N) mul.
    gamma = wgb_ref[gamma_row:gamma_row + 1, :]
    beta = wgb_ref[gamma_row + 1:gamma_row + 2, :]
    scale = gamma * jax.lax.rsqrt(var + jnp.float32(1e-5))
    y_bn = diff * scale + beta

    # ---- GELU (exact, erf-based; matches nn.GELU() default) ----
    inv_sqrt2 = jnp.float32(0.7071067811865476)
    o_ref[...] = (jnp.float32(0.5) * y_bn *
                  (jnp.float32(1.0) + jax.lax.erf(y_bn * inv_sqrt2))).astype(o_ref.dtype)


@jax.jit
def extra_feature_forward(x, wgb):
    """x: (B, C, F) f32; wgb: (round_up(K,8)+8, N) packed [W^T ; gamma ; beta]."""
    B = x.shape[0]
    K = x.shape[1] * x.shape[2]
    rows, N = wgb.shape
    gamma_row = rows - _SUBLANE                           # == round_up(K, 8)

    x_flat = x.reshape(B, K)                              # torch.flatten(x, start_dim=1)

    vmem = pl.BlockSpec(memory_space=pltpu.MemorySpace.VMEM)
    return pl.pallas_call(
        partial(extra_feature_kernel, k=K, gamma_row=gamma_row),
        out_shape=jax.ShapeDtypeStruct((B, N), jnp.float32),
        in_specs=[vmem, vmem],
        out_specs=vmem,
        cost_estimate=pl.CostEstimate(
            flops=2 * B * K * N,
            transcendentals=B * N,
            bytes_accessed=4 * (B * K + rows * N + B * N),
        ),
    )(x_flat, wgb)


def prepare_params(w, gamma, beta):
    """One-time parameter packing (lives with weight loading in a real model):
    transpose the PyTorch (N, K) Linear weight and append gamma/beta as extra
    sublane-aligned rows -> a single (round_up(K,8)+8, N) buffer, one DMA stream."""
    N, K = w.shape
    ka = _round_up(K, _SUBLANE)
    wgb = jnp.zeros((ka + _SUBLANE, N), jnp.float32)
    wgb = wgb.at[:K, :].set(w.T)
    wgb = wgb.at[ka, :].set(gamma.reshape(-1))
    wgb = wgb.at[ka + 1, :].set(beta.reshape(-1))
    return wgb


def _reference(x, w, b, gamma, beta):
    """Pure-JAX reference of the PyTorch forward — note it DOES apply the bias."""
    B = x.shape[0]
    xf = x.reshape(B, -1)
    y = xf @ w.T + b[None, :]
    mean = y.mean(axis=0, keepdims=True)
    var = ((y - mean) ** 2).mean(axis=0, keepdims=True)
    y = (y - mean) / jnp.sqrt(var + 1e-5) * gamma[None, :] + beta[None, :]
    return 0.5 * y * (1.0 + jax.lax.erf(y / jnp.sqrt(2.0)))


if __name__ == "__main__":
    # Shapes consistent with the module: B=8, in_channels=4, in_features=16, out=64.
    B, C, F_in, N = 8, 4, 16, 64
    K = C * F_in

    key = jax.random.PRNGKey(0)
    kx, kw, kb, kg, kbt = jax.random.split(key, 5)

    x = jax.random.normal(kx, (B, C, F_in), dtype=jnp.float32)

    # nn.Linear default init: uniform(-1/sqrt(K), 1/sqrt(K)).
    bound = 1.0 / math.sqrt(K)
    w = jax.random.uniform(kw, (N, K), minval=-bound, maxval=bound, dtype=jnp.float32)
    b = jax.random.uniform(kb, (N,), minval=-bound, maxval=bound, dtype=jnp.float32)

    # Non-trivial BN affine params to exercise the gamma-fusion path.
    gamma = 1.0 + 0.1 * jax.random.normal(kg, (N,), dtype=jnp.float32)
    beta = 0.1 * jax.random.normal(kbt, (N,), dtype=jnp.float32)

    # One-time packing (Linear bias intentionally NOT passed to the kernel).
    wgb = prepare_params(w, gamma, beta)

    out = jax.block_until_ready(extra_feature_forward(x, wgb))

    ref = _reference(x, w, b, gamma, beta)
    assert out.shape == (B, N)
    assert jnp.allclose(out, ref, atol=1e-4, rtol=1e-4), "mismatch vs reference"

    print("KERNEL_OK")
</pallas_src>

<mosaic_0001>
module attributes {stable_mosaic.version = 11 : i64} {
  func.func @extra_feature_kernel(%arg0: memref<8x64xf32, #tpu.memory_space<vmem>>, %arg1: memref<72x64xf32, #tpu.memory_space<vmem>>, %arg2: memref<8x64xf32, #tpu.memory_space<vmem>>) attributes {dimension_semantics = [], scalar_prefetch = 0 : i64, scratch_operands = 0 : i64, tpu.core_type = #tpu.core_type<tc>} {
    %c0 = arith.constant 0 : index
    %c0_0 = arith.constant 0 : index
    %0 = vector.load %arg1[%c0, %c0_0] : memref<72x64xf32, #tpu.memory_space<vmem>>, vector<64x64xf32>
    %c0_1 = arith.constant 0 : index
    %c0_2 = arith.constant 0 : index
    %1 = vector.load %arg0[%c0_1, %c0_2] : memref<8x64xf32, #tpu.memory_space<vmem>>, vector<8x64xf32>
    %cst = arith.constant dense<0.000000e+00> : vector<8x64xf32>
    %2 = tpu.matmul %1, %0, %cst {dimension_numbers = #tpu.dot_dimension_numbers<[1], [0], [0], [1], [0, 0, 1, 1], [], []>} : vector<8x64xf32>, vector<64x64xf32>, vector<8x64xf32> -> vector<8x64xf32>
    %cst_3 = arith.constant dense<0.000000e+00> : vector<64xf32>
    %3 = vector.multi_reduction <add>, %2, %cst_3 [0] : vector<8x64xf32> to vector<64xf32>
    %4 = vector.shape_cast %3 : vector<64xf32> to vector<1x64xf32>
    %cst_4 = arith.constant 8.000000e+00 : f32
    %5 = vector.broadcast %cst_4 : f32 to vector<1x64xf32>
    %6 = arith.divf %4, %5 : vector<1x64xf32>
    %7 = vector.broadcast %6 : vector<1x64xf32> to vector<8x64xf32>
    %8 = arith.subf %2, %7 : vector<8x64xf32>
    %9 = arith.mulf %8, %8 : vector<8x64xf32>
    %cst_5 = arith.constant dense<0.000000e+00> : vector<64xf32>
    %10 = vector.multi_reduction <add>, %9, %cst_5 [0] : vector<8x64xf32> to vector<64xf32>
    %11 = vector.shape_cast %10 : vector<64xf32> to vector<1x64xf32>
    %cst_6 = arith.constant 8.000000e+00 : f32
    %12 = vector.broadcast %cst_6 : f32 to vector<1x64xf32>
    %13 = arith.divf %11, %12 : vector<1x64xf32>
    %c64 = arith.constant 64 : index
    %c0_7 = arith.constant 0 : index
    %14 = vector.load %arg1[%c64, %c0_7] : memref<72x64xf32, #tpu.memory_space<vmem>>, vector<1x64xf32>
    %c65 = arith.constant 65 : index
    %c0_8 = arith.constant 0 : index
    %15 = vector.load %arg1[%c65, %c0_8] : memref<72x64xf32, #tpu.memory_space<vmem>>, vector<1x64xf32>
    %cst_9 = arith.constant 9.99999974E-6 : f32
    %16 = vector.broadcast %cst_9 : f32 to vector<1x64xf32>
    %17 = arith.addf %13, %16 : vector<1x64xf32>
    %18 = math.rsqrt %17 : vector<1x64xf32>
    %19 = arith.mulf %14, %18 : vector<1x64xf32>
    %20 = vector.broadcast %19 : vector<1x64xf32> to vector<8x64xf32>
    %21 = arith.mulf %8, %20 : vector<8x64xf32>
    %22 = vector.broadcast %15 : vector<1x64xf32> to vector<8x64xf32>
    %23 = arith.addf %21, %22 : vector<8x64xf32>
    %cst_10 = arith.constant 5.000000e-01 : f32
    %24 = vector.broadcast %cst_10 : f32 to vector<8x64xf32>
    %25 = arith.mulf %24, %23 : vector<8x64xf32>
    %cst_11 = arith.constant 0.707106769 : f32
    %26 = vector.broadcast %cst_11 : f32 to vector<8x64xf32>
    %27 = arith.mulf %23, %26 : vector<8x64xf32>
    %28 = math.erf %27 : vector<8x64xf32>
    %cst_12 = arith.constant 1.000000e+00 : f32
    %29 = vector.broadcast %cst_12 : f32 to vector<8x64xf32>
    %30 = arith.addf %29, %28 : vector<8x64xf32>
    %31 = arith.mulf %25, %30 : vector<8x64xf32>
    %c0_13 = arith.constant 0 : index
    %c0_14 = arith.constant 0 : index
    %32 = vector.load %arg2[%c0_13, %c0_14] : memref<8x64xf32, #tpu.memory_space<vmem>>, vector<8x64xf32>
    tpu.vector_store %arg2[%c0_13, %c0_14], %31 {strides = array<i32>} : memref<8x64xf32, #tpu.memory_space<vmem>>, vector<8x64xf32>,
    return
  }
}

</mosaic_0001>

<bundles_post_ra>
// kernel: extra_feature_forward.1
= control target key start
LH: loop header
LB: loop body
LE: loop exit
PB: predicated region body
PF: predicated region fallthrough
CT: control target
= control target key end

     0   :  { %s243_s0 = inlined_call_operand.vmem [shape: f32[8,64], index: 0, kind: input, shape index: {}]   ;;  %s244_s1 = inlined_call_operand.vmem [shape: f32[72,64], index: 1, kind: input, shape index: {}]   ;;  %s245_s2 = inlined_call_operand.hbm [shape: f32[8,64], index: 2, kind: output, shape index: {}]  }
   0x1   :  { %v19_v0 = vld [vmem:[%s244_s1 + $0x38] sm:$0xff]  ;;  %v18_v1 = vld [vmem:[%s244_s1 + $0x30] sm:$0xff]  ;;  %v17_v2 = vld [vmem:[%s244_s1 + $0x28] sm:$0xff] }
   0x2   :  { %33 = vmatpush.msra.mxu0 %v19_v0 }
   0x4   :  { %34 = vmatpush.msra.mxu0 %v18_v1 }
   0x5   :  { %7 = vsyncpa [#allocation3], 0  ;;  %v16_v3 = vld [vmem:[%s244_s1 + $0x20] sm:$0xff]  ;;  %v15_v4 = vld [vmem:[%s244_s1 + $0x18] sm:$0xff]  ;;  %vm21_vm0 = vcmask 523264   ;;  %v186_v9 = vmov 8.0  }
   0x6   :  { %35 = vmatpush.msra.mxu0 %v17_v2  ;;  %v14_v5 = vld [vmem:[%s244_s1 + $0x10] sm:$0xff]  ;;  %v13_v6 = vld [vmem:[%s244_s1 + $0x8] sm:$0xff]  ;;  %v12_v7 = vld [vmem:[%s244_s1] sm:$0xff]  ;;  %154 = vrcp.f32 %v186_v9  ;;  %s140_s5 = sshll.u32 %s245_s2, 4  ;;  %s141_s5 = int_to_ptr.hbm [resolvable:$true] %s140_s5 }
   0x7   :  { %v20_v8 = vld [vmem:[%s243_s0] sm:$0xff] }
   0x8   :  { %36 = vmatpush.msra.mxu0 %v16_v3  ;;  %v70_v41 = vld [vmem:[%s244_s1 + $0x40] sm:$0x1]  ;;  %v153_v46 = vld [vmem:[%s244_s1 + $0x41] ss:$0 sm:$0xff]  ;;  %s187_s1 = smov [#allocation2]  }
   0x9   :  { %s138_s30 = sshll.u32 %s187_s1, 4  ;;  %s139_s30 = int_to_ptr.vmem [resolvable:$true] %s138_s30 }
   0xa   :  { %37 = vmatpush.msra.mxu0 %v15_v4 }
   0xc   :  { %38 = vmatpush.msra.mxu0 %v14_v5  ;;  %v155_v10 = vpop.eup %154 }
   0xd   :  { %v53_v11 = vmul.f32 8.0, %v155_v10  ;;  %vm57_vm1 = vweird.f32 %v155_v10 }
   0xe   :  { %39 = vmatpush.msra.mxu0 %v13_v6 }
   0xf   :  { %v54_v12 = vsub.f32 1.0, %v53_v11 }
  0x10   :  { %40 = vmatpush.msra.mxu0 %v12_v7 }
  0x11   :  { %149 = vmatmul.msk.f32.vlgmr.msra.gmra.mxu0 %vm21_vm0, %v20_v8  ;;  %v55_v16 = vmul.f32 %v155_v10, %v54_v12 }
  0x13   :  { %v56_v19 = vadd.f32 %v155_v10, %v55_v16 }
  0x15   :  { %v58_v22 = vsel %vm57_vm1, %v155_v10, %v56_v19 }
  0x8e   :  { %v42_v13 = vpop.f32.mrf.mxu0 }
  0x8f   :  { %v45_v14 = vsel %vm21_vm0, %v42_v13, 0.0 }
  0x90   :  { %v46_v15 = vrot.slane %v45_v14, 4 }
  0x92   :  { %v47_v17 = vadd.f32 %v46_v15, %v45_v14 }
  0x94   :  { %v48_v18 = vrot.slane %v47_v17, 2 }
  0x96   :  { %v49_v20 = vadd.f32 %v48_v18, %v47_v17 }
  0x98   :  { %v50_v21 = vrot.slane %v49_v20, 1 }
  0x9a   :  { %v51_v23 = vadd.f32 %v50_v21, %v49_v20 }
  0x9c   :  { %v59_v24 = vmul.f32 %v58_v22, %v51_v23 }
  0x9e   :  { %v60_v25 = vsub.f32 %v42_v13, %v59_v24 }
  0xa0   :  { %v61_v26 = vmul.f32 %v60_v25, %v60_v25 }
  0xa2   :  { %v62_v27 = vsel %vm21_vm0, %v61_v26, 0.0 }
  0xa3   :  { %v63_v28 = vrot.slane %v62_v27, 4 }
  0xa5   :  { %v64_v29 = vadd.f32 %v63_v28, %v62_v27 }
  0xa7   :  { %v65_v30 = vrot.slane %v64_v29, 2 }
  0xa9   :  { %v66_v31 = vadd.f32 %v65_v30, %v64_v29 }
  0xab   :  { %v67_v32 = vrot.slane %v66_v31, 1 }
  0xad   :  { %v68_v33 = vadd.f32 %v67_v32, %v66_v31 }
  0xaf   :  { %v69_v34 = vmul.f32 %v68_v33, %v58_v22 }
  0xb1   :  { %v72_v35 = vadd.f32 1e-05, %v69_v34 }
  0xb3   :  { %156 = vrsqrt.f32 %v72_v35  ;;  %vm79_vm3 = vweird.f32 %v72_v35 }
  0xb9   :  { %v157_v36 = vpop.eup %156 }
  0xba   :  { %v74_v37 = vmul.f32 %v157_v36, %v72_v35  ;;  %vm80_vm2 = vweird.f32 %v157_v36 }
  0xbb   :  { %vm81_vm4 = vmor %vm79_vm3, %vm80_vm2 }
  0xbc   :  { %v75_v38 = vmul.f32 %v157_v36, %v74_v37 }
  0xbe   :  { %v76_v39 = vmul.f32 0.5, %v75_v38 }
  0xc0   :  { %v77_v40 = vsub.f32 1.5, %v76_v39 }
  0xc2   :  { %v78_v42 = vmul.f32 %v157_v36, %v77_v40 }
  0xc4   :  { %v82_v43 = vsel %vm81_vm4, %v157_v36, %v78_v42 }
  0xc5   :  { %v83_v44 = vmul.f32 %v82_v43, %v70_v41 }
  0xc7   :  { %v84_v45 = vperm.slane %v83_v44, 0 }
  0xc9   :  { %v85_v47 = vmul.f32 %v84_v45, %v60_v25 }
  0xcb   :  { %v87_v48 = vadd.f32 %v153_v46, %v85_v47 }
  0xcd   :  { %v89_v49 = vmul.f32 0.70710677, %v87_v48  ;;  %v88_v21 = vmul.f32 0.5, %v87_v48 }
  0xcf   :  { %v90_v50 = vmul.f32 %v89_v49, %v89_v49 }
  0xd1   :  { %v91_v51 = vmin.f32 %v90_v50, 16.0 }
  0xd3   :  { %v92_v52 = vmul.f32 2.1237322e-06, %v91_v51  ;;  %v103_v53 = vmul.f32 3.8918573e-05, %v91_v51 }
  0xd5   :  { %v93_v54 = vadd.f32 0.00028619796, %v92_v52  ;;  %v104_v55 = vadd.f32 0.001143296, %v103_v53 }
  0xd7   :  { %v94_v56 = vmul.f32 %v93_v54, %v91_v51  ;;  %v105_v57 = vmul.f32 %v104_v55, %v91_v51 }
  0xd9   :  { %v106_v58 = vadd.f32 0.014752088, %v105_v57  ;;  %v95_v59 = vadd.f32 0.0036580483, %v94_v56 }
  0xdb   :  { %v107_v60 = vmul.f32 %v106_v58, %v91_v51  ;;  %v96_v62 = vmul.f32 %v95_v59, %v91_v51 }
  0xdd   :  { %v108_v61 = vadd.f32 0.112945676, %v107_v60  ;;  %v97_v1 = vadd.f32 0.05243302, %v96_v62 }
  0xdf   :  { %v109_v63 = vmul.f32 %v108_v61, %v91_v51  ;;  %v98_v4 = vmul.f32 %v97_v1, %v91_v51 }
  0xe1   :  { %v110_v0 = vadd.f32 0.4994258, %v109_v63  ;;  %v99_v5 = vadd.f32 0.18741608, %v98_v4 }
  0xe3   :  { %v111_v2 = vmul.f32 %v110_v0, %v91_v51  ;;  %v100_v7 = vmul.f32 %v99_v5, %v91_v51 }
  0xe5   :  { %v112_v3 = vadd.f32 1.0, %v111_v2  ;;  %v101_v11 = vadd.f32 1.1283791, %v100_v7 }
  0xe7   :  { %158 = vrcp.f32 %v112_v3  ;;  %v124_v10 = vand.u32 2147483648, %v112_v3  ;;  %v122_v13 = vand.u32 2147483647, %v112_v3  ;;  %vm118_vm6 = vweird.f32 %v112_v3 }
  0xe8   :  { %v102_v16 = vmul.f32 %v101_v11, %v89_v49 }
  0xe9   :  { %v125_v15 = vor.u32 1.1754944e-38, %v124_v10  ;;  %vm123_vm8 = vcmp.eq.f32.partialorder %v122_v13, 8.507059e+37 }
  0xed   :  { %v159_v6 = vpop.eup %158 }
  0xee   :  { %v114_v8 = vmul.f32 %v159_v6, %v112_v3  ;;  %vm119_vm5 = vweird.f32 %v159_v6 }
  0xef   :  { %vm120_vm7 = vmor %vm118_vm6, %vm119_vm5 }
  0xf0   :  { %v115_v9 = vsub.f32 1.0, %v114_v8 }
  0xf2   :  { %v116_v12 = vmul.f32 %v159_v6, %v115_v9 }
  0xf4   :  { %v117_v14 = vadd.f32 %v159_v6, %v116_v12 }
  0xf6   :  { %v121_v17 = vsel %vm120_vm7, %v159_v6, %v117_v14 }
  0xf7   :  { %v126_v18 = vsel %vm123_vm8, %v125_v15, %v121_v17 }
  0xf8   :  { %v127_v19 = vmul.f32 %v126_v18, %v102_v16 }
  0xfa   :  { %v150_v20 = vclamps-f32 %v127_v19, 1.0 }
  0xfc   :  { %v130_v22 = vadd.f32 1.0, %v150_v20 }
  0xfe   :  { %v131_v23 = vmul.f32 %v130_v22, %v88_v21 }
 0x100   :  { %132 = vst.msk [vmem:[#allocation2] sm:$0xff] %vm21_vm0, %v131_v23 }
 0x101   :  { %143 = dma.vmem_to_hbm [thread:$0]  %s139_s30, 128, %s141_s5, [#allocation3]  }
 0x102   :  { %184 = dma.done.wait [#allocation3], 128  }
 0x103   :  { %185 = vsyncadd [#allocation3], 4294967168 }
 0x104   :  { %148 = vsyncpa [#allocation3], 1 }

</bundles_post_ra>
